<compile_context>
chip_gen: v7x
topology: tpu7x:2x2x1
jax: 0.10.0
libtpu: 0.0.40
codegen_flags: <defaults>
</compile_context>

<pallas_src>
import functools

import jax
import jax.numpy as jnp
from jax.experimental import pallas as pl
from jax.experimental.pallas import tpu as pltpu

_ACT_NAMES = {1: "relu", 2: "tanh", 3: "sigmoid", 4: "silu"}
_SUBLANE = 8


def _round_up(x, m):
    return (x + m - 1) // m * m


def _apply_act(h, a):
    if a == "tanh":
        return jnp.tanh(h)
    if a == "relu":
        return jnp.maximum(h, 0.0)
    if a == "sigmoid":
        return jax.nn.sigmoid(h)
    if a == "silu":
        return h * jax.nn.sigmoid(h)
    if a == "linear":
        return h
    raise ValueError(f"unknown act {a}")


def _layer_acts(n_neurons, act_type):
    """Per-layer activation names in execution order (encoder then decoder)."""
    act = _ACT_NAMES[act_type]
    n_enc = len(n_neurons) - 1
    acts = []
    for li in range(2 * n_enc):
        is_embedding = li == n_enc - 1        # last encoder layer -> linear
        is_output = li == 2 * n_enc - 1       # last decoder layer -> linear
        acts.append("linear" if (is_embedding or is_output) else act)
    return tuple(acts)


def _fused_ae_kernel(*refs, acts):
    """Whole encoder+decoder in one kernel; activations never leave vregs/VMEM.

    refs = (x_ref, w0, b0, w1, b1, ..., w_{L-1}, b_{L-1}, o_ref)
    """
    x_ref = refs[0]
    o_ref = refs[-1]
    wb = refs[1:-1]

    h = x_ref[...]
    for li, a in enumerate(acts):
        w = wb[2 * li][...]
        b = wb[2 * li + 1][...]
        # MXU matmul (bf16 or f32 operands) with f32 accumulation;
        # bias add + activation stay f32 on VPU/EUP.
        y = jnp.dot(h.astype(w.dtype), w, preferred_element_type=jnp.float32)
        h = _apply_act(y + b.astype(jnp.float32), a)
    o_ref[...] = h.astype(o_ref.dtype)


def ae_forward(x, params, n_neurons, act_type=2, batch_tile=512,
               compute_dtype=jnp.float32, out_dtype=None):
    """AE forward pass as a single fused Pallas kernel with a batch grid.

    params: list of (w, b) in execution order; w: (din, dout), b: (1, dout).
    compute_dtype: matmul-operand dtype.  jnp.bfloat16 recommended on
        v6e/v7x (and v5e when exactness isn't required); accumulation, bias
        add and activations are always f32.
    out_dtype: output dtype (default: x.dtype).
    """
    n_neurons = tuple(int(d) for d in n_neurons)
    acts = _layer_acts(n_neurons, act_type)
    assert len(params) == len(acts)

    B, D0 = x.shape
    assert D0 == n_neurons[0]
    out_dtype = x.dtype if out_dtype is None else jnp.dtype(out_dtype)

    # --- batch tiling --------------------------------------------------------
    # Multiple of 8 sublanes; capped so there are >= 2 grid steps whenever the
    # batch allows it (otherwise one v7x TensorCore would idle).
    B_al = _round_up(B, _SUBLANE)
    tile = min(_round_up(int(batch_tile), _SUBLANE), B_al)
    if B_al // tile < 2 and B_al >= 2 * _SUBLANE:
        tile = _round_up(-(-B_al // 2), _SUBLANE)     # ceil(B_al/2), 8-aligned
    B_pad = _round_up(B, tile)

    # Row-pad only when the batch isn't a multiple of the tile.  No lane
    # padding anywhere: ragged feature dims are full-extent in the BlockSpecs.
    xp = x if B_pad == B else jnp.zeros((B_pad, D0), x.dtype).at[:B].set(x)

    # --- weights / biases ----------------------------------------------------
    # Cast weights once to the compute dtype (bf16 halves weight DMA bytes and
    # uses the native MXU path); biases stay f32 (added to the f32 accumulator).
    wb_flat = []
    w_bytes = 0
    for (w, b) in params:
        din, dout = w.shape
        wb_flat.append(w.astype(compute_dtype))
        wb_flat.append(jnp.reshape(b, (1, dout)).astype(jnp.float32))
        w_bytes += din * dout * jnp.dtype(compute_dtype).itemsize + dout * 4

    # Weight/bias BlockSpecs: full-extent blocks + constant index_map keep them
    # VMEM-resident across grid steps.  For big models single-buffer them
    # (constant index_map never re-fetches; double-buffering is pure waste).
    single_buffer_weights = w_bytes > (4 << 20)
    w_spec_kwargs = (
        dict(pipeline_mode=pl.Buffered(1)) if single_buffer_weights else {}
    )

    in_specs = [pl.BlockSpec((tile, D0), lambda i: (i, 0))]
    for (w, b) in params:
        din, dout = w.shape
        in_specs.append(pl.BlockSpec((din, dout), lambda i: (0, 0), **w_spec_kwargs))
        in_specs.append(pl.BlockSpec((1, dout), lambda i: (0, 0), **w_spec_kwargs))
    out_spec = pl.BlockSpec((tile, D0), lambda i: (i, 0))

    # --- explicit VMEM budget (v5e scoped default is only 16 MiB) ------------
    wbuf = 1 if single_buffer_weights else 2
    io_bytes = 2 * tile * D0 * (x.dtype.itemsize + out_dtype.itemsize)  # 2x buffered
    act_bytes = 4 * tile * max(n_neurons) * 4                           # intermediates
    vmem_limit = int(min(100 << 20,
                         max(16 << 20,
                             2 * (wbuf * w_bytes + io_bytes + act_bytes))))

    # --- advisory cost estimate so XLA schedules around the kernel -----------
    dims = [w.shape for (w, _) in params]
    flops = 2 * B_pad * sum(din * dout for din, dout in dims)
    transcendentals = B_pad * sum(
        dout for (din, dout), a in zip(dims, acts)
        if a in ("tanh", "sigmoid", "silu"))
    bytes_accessed = (B_pad * D0 * x.dtype.itemsize
                      + B_pad * D0 * out_dtype.itemsize
                      + w_bytes)

    kernel = functools.partial(_fused_ae_kernel, acts=acts)
    out_padded = pl.pallas_call(
        kernel,
        out_shape=jax.ShapeDtypeStruct((B_pad, D0), out_dtype),
        grid_spec=pltpu.PrefetchScalarGridSpec(
            num_scalar_prefetch=0,
            grid=(B_pad // tile,),
            in_specs=in_specs,
            out_specs=out_spec,
        ),
        compiler_params=pltpu.CompilerParams(
            # Batch axis is embarrassingly parallel -> v7x megacore split.
            dimension_semantics=("parallel",),
            vmem_limit_bytes=vmem_limit,
        ),
        cost_estimate=pl.CostEstimate(
            flops=flops,
            transcendentals=transcendentals,
            bytes_accessed=bytes_accessed),
    )(xp, *wb_flat)

    # No lane slicing; drop padded rows only if any were added.
    return out_padded if B_pad == B else out_padded[:B]


def ae_forward_ref(x, params, n_neurons, act_type=2):
    """Pure-JAX reference (no Pallas) for the correctness check."""
    acts = _layer_acts(tuple(n_neurons), act_type)
    h = x
    for (w, b), a in zip(params, acts):
        h = _apply_act(h @ w + jnp.reshape(b, (1, -1)), a)
    return h


def init_ae_params(n_neurons, key):
    """Deterministic params mimicking nn.Linear's U(-1/sqrt(fan_in), 1/sqrt(fan_in))."""
    dims = []
    for i in range(len(n_neurons) - 1):            # encoder
        dims.append((n_neurons[i], n_neurons[i + 1]))
    for i in range(len(n_neurons) - 1):            # decoder (mirror)
        dims.append((n_neurons[-1 - i], n_neurons[-2 - i]))
    params = []
    for (din, dout) in dims:
        key, kw, kb = jax.random.split(key, 3)
        bound = 1.0 / jnp.sqrt(jnp.float32(din))
        w = jax.random.uniform(kw, (din, dout), jnp.float32, -bound, bound)
        b = jax.random.uniform(kb, (1, dout), jnp.float32, -bound, bound)
        params.append((w, b))
    return params


if __name__ == "__main__":
    # Small, shape-consistent example: AE([64, 32, 16, 8], act_type=2 -> Tanh)
    n_neurons = (64, 32, 16, 8)
    act_type = 2
    batch = 8

    key = jax.random.PRNGKey(0)
    key, kx = jax.random.split(key)
    x = jax.random.normal(kx, (batch, n_neurons[0]), jnp.float32)
    params = init_ae_params(n_neurons, key)

    ref = ae_forward_ref(x, params, n_neurons, act_type)

    # f32 matmul-operand path (default): exact vs pure-JAX reference.
    fwd_f32 = jax.jit(lambda xx, pp: ae_forward(xx, pp, n_neurons, act_type,
                                                compute_dtype=jnp.float32))
    out_f32 = jax.block_until_ready(fwd_f32(x, params))
    assert out_f32.shape == (batch, n_neurons[0])
    assert jnp.allclose(out_f32, ref, atol=1e-4, rtol=1e-4), "f32 mismatch vs JAX reference"

    # bf16 matmul-operand path (recommended on v6e/v7x): f32 accumulation,
    # bias and activations, so the error is bf16-rounding only -> loose check.
    fwd_bf16 = jax.jit(lambda xx, pp: ae_forward(xx, pp, n_neurons, act_type,
                                                 compute_dtype=jnp.bfloat16))
    out_bf16 = jax.block_until_ready(fwd_bf16(x, params))
    assert out_bf16.shape == (batch, n_neurons[0])
    assert jnp.allclose(out_bf16.astype(jnp.float32), ref, atol=1e-1, rtol=1e-1), \
        "bf16 path diverged beyond bf16 tolerance"

    print("KERNEL_OK")
</pallas_src>

<mosaic_0001>
module attributes {stable_mosaic.version = 11 : i64} {
  func.func @_fused_ae_kernel(%arg0: i32, %arg1: memref<8x64xf32, #tpu.memory_space<vmem>>, %arg2: memref<64x32xf32, #tpu.memory_space<vmem>>, %arg3: memref<1x32xf32, #tpu.memory_space<vmem>>, %arg4: memref<32x16xf32, #tpu.memory_space<vmem>>, %arg5: memref<1x16xf32, #tpu.memory_space<vmem>>, %arg6: memref<16x8xf32, #tpu.memory_space<vmem>>, %arg7: memref<1x8xf32, #tpu.memory_space<vmem>>, %arg8: memref<8x16xf32, #tpu.memory_space<vmem>>, %arg9: memref<1x16xf32, #tpu.memory_space<vmem>>, %arg10: memref<16x32xf32, #tpu.memory_space<vmem>>, %arg11: memref<1x32xf32, #tpu.memory_space<vmem>>, %arg12: memref<32x64xf32, #tpu.memory_space<vmem>>, %arg13: memref<1x64xf32, #tpu.memory_space<vmem>>, %arg14: memref<8x64xf32, #tpu.memory_space<vmem>>) attributes {dimension_semantics = [#tpu.dimension_semantics<parallel>], iteration_bounds = array<i64: 1>, scalar_prefetch = 0 : i64, scratch_operands = 0 : i64, tpu.core_type = #tpu.core_type<tc>, window_params = [{transform_indices = @transform_0, window_bounds = array<i64: 8, 64>}, {pipeline_mode = #tpu.pipeline_mode<synchronous>, transform_indices = @transform_1, window_bounds = array<i64: 64, 32>}, {pipeline_mode = #tpu.pipeline_mode<synchronous>, transform_indices = @transform_2, window_bounds = array<i64: 1, 32>}, {pipeline_mode = #tpu.pipeline_mode<synchronous>, transform_indices = @transform_3, window_bounds = array<i64: 32, 16>}, {pipeline_mode = #tpu.pipeline_mode<synchronous>, transform_indices = @transform_4, window_bounds = array<i64: 1, 16>}, {pipeline_mode = #tpu.pipeline_mode<synchronous>, transform_indices = @transform_5, window_bounds = array<i64: 16, 8>}, {pipeline_mode = #tpu.pipeline_mode<synchronous>, transform_indices = @transform_6, window_bounds = array<i64: 1, 8>}, {pipeline_mode = #tpu.pipeline_mode<synchronous>, transform_indices = @transform_7, window_bounds = array<i64: 8, 16>}, {pipeline_mode = #tpu.pipeline_mode<synchronous>, transform_indices = @transform_8, window_bounds = array<i64: 1, 16>}, {pipeline_mode = #tpu.pipeline_mode<synchronous>, transform_indices = @transform_9, window_bounds = array<i64: 16, 32>}, {pipeline_mode = #tpu.pipeline_mode<synchronous>, transform_indices = @transform_10, window_bounds = array<i64: 1, 32>}, {pipeline_mode = #tpu.pipeline_mode<synchronous>, transform_indices = @transform_11, window_bounds = array<i64: 32, 64>}, {pipeline_mode = #tpu.pipeline_mode<synchronous>, transform_indices = @transform_12, window_bounds = array<i64: 1, 64>}, {transform_indices = @transform_13, window_bounds = array<i64: 8, 64>}]} {
    %c0 = arith.constant 0 : index
    %c0_0 = arith.constant 0 : index
    %0 = vector.load %arg1[%c0, %c0_0] : memref<8x64xf32, #tpu.memory_space<vmem>>, vector<8x64xf32>
    %c0_1 = arith.constant 0 : index
    %c0_2 = arith.constant 0 : index
    %1 = vector.load %arg2[%c0_1, %c0_2] : memref<64x32xf32, #tpu.memory_space<vmem>>, vector<64x32xf32>
    %c0_3 = arith.constant 0 : index
    %c0_4 = arith.constant 0 : index
    %2 = vector.load %arg3[%c0_3, %c0_4] : memref<1x32xf32, #tpu.memory_space<vmem>>, vector<1x32xf32>
    %cst = arith.constant dense<0.000000e+00> : vector<8x32xf32>
    %3 = tpu.matmul %0, %1, %cst {dimension_numbers = #tpu.dot_dimension_numbers<[1], [0], [0], [1], [0, 0, 1, 1], [], []>} : vector<8x64xf32>, vector<64x32xf32>, vector<8x32xf32> -> vector<8x32xf32>
    %4 = vector.broadcast %2 : vector<1x32xf32> to vector<8x32xf32>
    %5 = arith.addf %3, %4 : vector<8x32xf32>
    %6 = math.tanh %5 : vector<8x32xf32>
    %c0_5 = arith.constant 0 : index
    %c0_6 = arith.constant 0 : index
    %7 = vector.load %arg4[%c0_5, %c0_6] : memref<32x16xf32, #tpu.memory_space<vmem>>, vector<32x16xf32>
    %c0_7 = arith.constant 0 : index
    %c0_8 = arith.constant 0 : index
    %8 = vector.load %arg5[%c0_7, %c0_8] : memref<1x16xf32, #tpu.memory_space<vmem>>, vector<1x16xf32>
    %cst_9 = arith.constant dense<0.000000e+00> : vector<8x16xf32>
    %9 = tpu.matmul %6, %7, %cst_9 {dimension_numbers = #tpu.dot_dimension_numbers<[1], [0], [0], [1], [0, 0, 1, 1], [], []>} : vector<8x32xf32>, vector<32x16xf32>, vector<8x16xf32> -> vector<8x16xf32>
    %10 = vector.broadcast %8 : vector<1x16xf32> to vector<8x16xf32>
    %11 = arith.addf %9, %10 : vector<8x16xf32>
    %12 = math.tanh %11 : vector<8x16xf32>
    %c0_10 = arith.constant 0 : index
    %c0_11 = arith.constant 0 : index
    %13 = vector.load %arg6[%c0_10, %c0_11] : memref<16x8xf32, #tpu.memory_space<vmem>>, vector<16x8xf32>
    %c0_12 = arith.constant 0 : index
    %c0_13 = arith.constant 0 : index
    %14 = vector.load %arg7[%c0_12, %c0_13] : memref<1x8xf32, #tpu.memory_space<vmem>>, vector<1x8xf32>
    %cst_14 = arith.constant dense<0.000000e+00> : vector<8x8xf32>
    %15 = tpu.matmul %12, %13, %cst_14 {dimension_numbers = #tpu.dot_dimension_numbers<[1], [0], [0], [1], [0, 0, 1, 1], [], []>} : vector<8x16xf32>, vector<16x8xf32>, vector<8x8xf32> -> vector<8x8xf32>
    %16 = vector.broadcast %14 : vector<1x8xf32> to vector<8x8xf32>
    %17 = arith.addf %15, %16 : vector<8x8xf32>
    %c0_15 = arith.constant 0 : index
    %c0_16 = arith.constant 0 : index
    %18 = vector.load %arg8[%c0_15, %c0_16] : memref<8x16xf32, #tpu.memory_space<vmem>>, vector<8x16xf32>
    %c0_17 = arith.constant 0 : index
    %c0_18 = arith.constant 0 : index
    %19 = vector.load %arg9[%c0_17, %c0_18] : memref<1x16xf32, #tpu.memory_space<vmem>>, vector<1x16xf32>
    %cst_19 = arith.constant dense<0.000000e+00> : vector<8x16xf32>
    %20 = tpu.matmul %17, %18, %cst_19 {dimension_numbers = #tpu.dot_dimension_numbers<[1], [0], [0], [1], [0, 0, 1, 1], [], []>} : vector<8x8xf32>, vector<8x16xf32>, vector<8x16xf32> -> vector<8x16xf32>
    %21 = vector.broadcast %19 : vector<1x16xf32> to vector<8x16xf32>
    %22 = arith.addf %20, %21 : vector<8x16xf32>
    %23 = math.tanh %22 : vector<8x16xf32>
    %c0_20 = arith.constant 0 : index
    %c0_21 = arith.constant 0 : index
    %24 = vector.load %arg10[%c0_20, %c0_21] : memref<16x32xf32, #tpu.memory_space<vmem>>, vector<16x32xf32>
    %c0_22 = arith.constant 0 : index
    %c0_23 = arith.constant 0 : index
    %25 = vector.load %arg11[%c0_22, %c0_23] : memref<1x32xf32, #tpu.memory_space<vmem>>, vector<1x32xf32>
    %cst_24 = arith.constant dense<0.000000e+00> : vector<8x32xf32>
    %26 = tpu.matmul %23, %24, %cst_24 {dimension_numbers = #tpu.dot_dimension_numbers<[1], [0], [0], [1], [0, 0, 1, 1], [], []>} : vector<8x16xf32>, vector<16x32xf32>, vector<8x32xf32> -> vector<8x32xf32>
    %27 = vector.broadcast %25 : vector<1x32xf32> to vector<8x32xf32>
    %28 = arith.addf %26, %27 : vector<8x32xf32>
    %29 = math.tanh %28 : vector<8x32xf32>
    %c0_25 = arith.constant 0 : index
    %c0_26 = arith.constant 0 : index
    %30 = vector.load %arg12[%c0_25, %c0_26] : memref<32x64xf32, #tpu.memory_space<vmem>>, vector<32x64xf32>
    %c0_27 = arith.constant 0 : index
    %c0_28 = arith.constant 0 : index
    %31 = vector.load %arg13[%c0_27, %c0_28] : memref<1x64xf32, #tpu.memory_space<vmem>>, vector<1x64xf32>
    %cst_29 = arith.constant dense<0.000000e+00> : vector<8x64xf32>
    %32 = tpu.matmul %29, %30, %cst_29 {dimension_numbers = #tpu.dot_dimension_numbers<[1], [0], [0], [1], [0, 0, 1, 1], [], []>} : vector<8x32xf32>, vector<32x64xf32>, vector<8x64xf32> -> vector<8x64xf32>
    %33 = vector.broadcast %31 : vector<1x64xf32> to vector<8x64xf32>
    %34 = arith.addf %32, %33 : vector<8x64xf32>
    %c0_30 = arith.constant 0 : index
    %c0_31 = arith.constant 0 : index
    %35 = vector.load %arg14[%c0_30, %c0_31] : memref<8x64xf32, #tpu.memory_space<vmem>>, vector<8x64xf32>
    tpu.vector_store %arg14[%c0_30, %c0_31], %34 {strides = array<i32>} : memref<8x64xf32, #tpu.memory_space<vmem>>, vector<8x64xf32>,
    return
  }
  func.func @transform_0(%arg0: i32) -> (i32, i32) {
    %c0_i32 = arith.constant 0 : i32
    %c0_i32_0 = arith.constant 0 : i32
    return %arg0, %c0_i32 : i32, i32
  }
  func.func @transform_1(%arg0: i32) -> (i32, i32) {
    %c0_i32 = arith.constant 0 : i32
    %c0_i32_0 = arith.constant 0 : i32
    %c0_i32_1 = arith.constant 0 : i32
    return %c0_i32, %c0_i32_0 : i32, i32
  }
  func.func @transform_2(%arg0: i32) -> (i32, i32) {
    %c0_i32 = arith.constant 0 : i32
    %c0_i32_0 = arith.constant 0 : i32
    %c0_i32_1 = arith.constant 0 : i32
    return %c0_i32, %c0_i32_0 : i32, i32
  }
  func.func @transform_3(%arg0: i32) -> (i32, i32) {
    %c0_i32 = arith.constant 0 : i32
    %c0_i32_0 = arith.constant 0 : i32
    %c0_i32_1 = arith.constant 0 : i32
    return %c0_i32, %c0_i32_0 : i32, i32
  }
  func.func @transform_4(%arg0: i32) -> (i32, i32) {
    %c0_i32 = arith.constant 0 : i32
    %c0_i32_0 = arith.constant 0 : i32
    %c0_i32_1 = arith.constant 0 : i32
    return %c0_i32, %c0_i32_0 : i32, i32
  }
  func.func @transform_5(%arg0: i32) -> (i32, i32) {
    %c0_i32 = arith.constant 0 : i32
    %c0_i32_0 = arith.constant 0 : i32
    %c0_i32_1 = arith.constant 0 : i32
    return %c0_i32, %c0_i32_0 : i32, i32
  }
  func.func @transform_6(%arg0: i32) -> (i32, i32) {
    %c0_i32 = arith.constant 0 : i32
    %c0_i32_0 = arith.constant 0 : i32
    %c0_i32_1 = arith.constant 0 : i32
    return %c0_i32, %c0_i32_0 : i32, i32
  }
  func.func @transform_7(%arg0: i32) -> (i32, i32) {
    %c0_i32 = arith.constant 0 : i32
    %c0_i32_0 = arith.constant 0 : i32
    %c0_i32_1 = arith.constant 0 : i32
    return %c0_i32, %c0_i32_0 : i32, i32
  }
  func.func @transform_8(%arg0: i32) -> (i32, i32) {
    %c0_i32 = arith.constant 0 : i32
    %c0_i32_0 = arith.constant 0 : i32
    %c0_i32_1 = arith.constant 0 : i32
    return %c0_i32, %c0_i32_0 : i32, i32
  }
  func.func @transform_9(%arg0: i32) -> (i32, i32) {
    %c0_i32 = arith.constant 0 : i32
    %c0_i32_0 = arith.constant 0 : i32
    %c0_i32_1 = arith.constant 0 : i32
    return %c0_i32, %c0_i32_0 : i32, i32
  }
  func.func @transform_10(%arg0: i32) -> (i32, i32) {
    %c0_i32 = arith.constant 0 : i32
    %c0_i32_0 = arith.constant 0 : i32
    %c0_i32_1 = arith.constant 0 : i32
    return %c0_i32, %c0_i32_0 : i32, i32
  }
  func.func @transform_11(%arg0: i32) -> (i32, i32) {
    %c0_i32 = arith.constant 0 : i32
    %c0_i32_0 = arith.constant 0 : i32
    %c0_i32_1 = arith.constant 0 : i32
    return %c0_i32, %c0_i32_0 : i32, i32
  }
  func.func @transform_12(%arg0: i32) -> (i32, i32) {
    %c0_i32 = arith.constant 0 : i32
    %c0_i32_0 = arith.constant 0 : i32
    %c0_i32_1 = arith.constant 0 : i32
    return %c0_i32, %c0_i32_0 : i32, i32
  }
  func.func @transform_13(%arg0: i32) -> (i32, i32) {
    %c0_i32 = arith.constant 0 : i32
    %c0_i32_0 = arith.constant 0 : i32
    return %arg0, %c0_i32 : i32, i32
  }
}

</mosaic_0001>

<bundles_post_ra>
// kernel: _lambda_.1
= control target key start
LH: loop header
LB: loop body
LE: loop exit
PB: predicated region body
PF: predicated region fallthrough
CT: control target
= control target key end

     0   :  { %v735_v3 = vmov 0.0|0.0   ;;  %vm736_vm0 = vmmov 0   ;;  %v737_v6 = vmov 0.0   ;;  %s934_s0 = inlined_call_operand.vmem [shape: f32[8,64], index: 0, kind: input, shape index: {}]   ;;  %s935_s1 = inlined_call_operand.vmem [shape: f32[64,32], index: 1, kind: input, shape index: {}]   ;;  %s936_s2 = inlined_call_operand.vmem [shape: f32[1,32], index: 2, kind: input, shape index: {}]   ;;  %s937_s3 = inlined_call_operand.vmem [shape: f32[32,16], index: 3, kind: input, shape index: {}]   ;;  %s938_s4 = inlined_call_operand.vmem [shape: f32[1,16], index: 4, kind: input, shape index: {}]   ;;  %s939_s5 = inlined_call_operand.vmem [shape: f32[16,8], index: 5, kind: input, shape index: {}]   ;;  %s940_s6 = inlined_call_operand.vmem [shape: f32[1,8], index: 6, kind: input, shape index: {}]   ;;  %s941_s7 = inlined_call_operand.vmem [shape: f32[8,16], index: 7, kind: input, shape index: {}]   ;;  %s942_s8 = inlined_call_operand.vmem [shape: f32[1,16], index: 8, kind: input, shape index: {}]   ;;  %s943_s9 = inlined_call_operand.vmem [shape: f32[16,32], index: 9, kind: input, shape index: {}]   ;;  %s944_s10 = inlined_call_operand.vmem [shape: f32[1,32], index: 10, kind: input, shape index: {}]   ;;  %s945_s11 = inlined_call_operand.vmem [shape: f32[32,64], index: 11, kind: input, shape index: {}]   ;;  %s946_s12 = inlined_call_operand.vmem [shape: f32[1,64], index: 12, kind: input, shape index: {}]   ;;  %s947_s13 = inlined_call_operand.hbm [shape: f32[8,64], index: 13, kind: output, shape index: {}]  }
   0x1   :  { %v46_v0 = vld [vmem:[%s935_s1] sm:$0xff]  ;;  %v47_v1 = vld [vmem:[%s935_s1 + $0x8] sm:$0xff]  ;;  %v48_v2 = vld [vmem:[%s935_s1 + $0x10] sm:$0xff]  ;;  %669 = vmatprep.subr.bf16.mxu0 %v735_v3  ;;  %625 = vmatprep.mubr.msk.f32.mxu0 %vm736_vm0, %v737_v6 }
   0x2   :  { %v670_v4 = vpack.c.bf16 %v47_v1, %v46_v0  ;;  %v49_v5 = vld [vmem:[%s935_s1 + $0x18] sm:$0xff]  ;;  %681 = vmatprep.subr.bf16.mxu1 %v735_v3  ;;  %636 = vmatprep.mubr.msk.f32.mxu1 %vm736_vm0, %v737_v6 }
   0x3   :  { %v673_v7 = vpack.c.bf16 %v49_v5, %v48_v2 }
   0x4   :  { %671 = vmatpush3.bf16.msra.mxu0 %v670_v4 }
   0x5   :  { %18 = vsyncpa [#allocation3], 0  ;;  %672 = vmatprep.subr.bf16.mxu0 %v735_v3  ;;  %v50_v8 = vld [vmem:[%s935_s1 + $0x20] sm:$0xff]  ;;  %v51_v9 = vld [vmem:[%s935_s1 + $0x28] sm:$0xff]  ;;  %vm61_vm1 = vcmask 523264   ;;  %vm147_vm2 = vcmask 261120  }
   0x6   :  { %v676_v10 = vpack.c.bf16 %v51_v9, %v50_v8  ;;  %v52_v11 = vld [vmem:[%s935_s1 + $0x30] sm:$0xff]  ;;  %v53_v12 = vld [vmem:[%s935_s1 + $0x38] sm:$0xff]  ;;  %v45_v14 = vld [vmem:[%s934_s0] sm:$0xff]  ;;  %vm231_vm3 = vcmask 130048   ;;  %vm313_vm4 = vcmask 64512  }
   0x7   :  { %v679_v13 = vpack.c.bf16 %v53_v12, %v52_v11  ;;  %v136_v15 = vld [vmem:[%s937_s3] sm:$0xff]  ;;  %v137_v16 = vld [vmem:[%s937_s3 + $0x8] sm:$0xff]  ;;  %v138_v17 = vld [vmem:[%s937_s3 + $0x10] sm:$0xff] }
   0x8   :  { %674 = vmatpush3.bf16.msra.mxu0 %v673_v7  ;;  %v682_v18 = vpack.c.bf16 %v137_v16, %v136_v15  ;;  %v139_v19 = vld [vmem:[%s937_s3 + $0x18] sm:$0xff]  ;;  %v570_v21 = vld [vmem:[%s936_s2] ss:$0 sm:$0xff]  ;;  %v223_v27 = vld [vmem:[%s939_s5 + $0x8] sm:$0xff] }
   0x9   :  { %675 = vmatprep.subr.bf16.mxu0 %v735_v3  ;;  %v685_v20 = vpack.c.bf16 %v139_v19, %v138_v17  ;;  %v222_v26 = vld [vmem:[%s939_s5] sm:$0xff]  ;;  %v389_v40 = vld [vmem:[%s943_s9 + $0x8] sm:$0xff]  ;;  %v473_v49 = vld [vmem:[%s945_s11 + $0x10] sm:$0xff] }
   0xa   :  { %683 = vmatpush3.bf16.msra.mxu1 %v682_v18  ;;  %v688_v28 = vpack.c.bf16 %v223_v27, %v222_v26  ;;  %v572_v29 = vld [vmem:[%s938_s4] ss:$0 sm:$0xff]  ;;  %v472_v48 = vld [vmem:[%s945_s11 + $0x8] sm:$0xff]  ;;  %v474_v51 = vld [vmem:[%s945_s11 + $0x18] sm:$0xff] }
   0xb   :  { %684 = vmatprep.subr.bf16.mxu1 %v735_v3  ;;  %v305_v33 = vld [vmem:[%s941_s7] sm:$0xff]  ;;  %v697_v52 = vpack.c.bf16 %v474_v51, %v473_v49 }
   0xc   :  { %677 = vmatpush3.bf16.msra.mxu0 %v676_v10  ;;  %v574_v35 = vld [vmem:[%s940_s6] ss:$0 sm:$0xff] }
   0xd   :  { %678 = vmatprep.subr.bf16.mxu0 %v735_v3  ;;  %v388_v39 = vld [vmem:[%s943_s9] sm:$0xff] }
   0xe   :  { %686 = vmatpush3.bf16.msra.mxu1 %v685_v20  ;;  %v691_v41 = vpack.c.bf16 %v389_v40, %v388_v39  ;;  %v576_v42 = vld [vmem:[%s942_s8] ss:$0 sm:$0xff] }
   0xf   :  { %687 = vmatprep.subr.bf16.mxu1 %v735_v3  ;;  %v471_v47 = vld [vmem:[%s945_s11] sm:$0xff]  ;;  %s738_s11 = smov [#allocation2]  }
  0x10   :  { %680 = vmatpush3.bf16.msra.mxu0 %v679_v13  ;;  %v694_v50 = vpack.c.bf16 %v472_v48, %v471_v47  ;;  %v578_v53 = vld [vmem:[%s944_s10] ss:$0 sm:$0xff]  ;;  %s562_s17 = sshll.u32 %s738_s11, 4  ;;  %s563_s17 = int_to_ptr.vmem [resolvable:$true] %s562_s17 }
  0x11   :  { %690 = vmatprep.subr.bf16.mxu0 %v735_v3  ;;  %v580_v58 = vld [vmem:[%s946_s12] ss:$0 sm:$0xff]  ;;  %s711_s10 = scalar_lea.vmem %s563_s17, 128  ;;  %p716_p1 = scmp.lt.s32.totalorder %s563_s17, %s563_s17 }
  0x12   :  { %p712_p0 = scmp.ne.s32.totalorder %s563_s17, %s711_s10  ;;  %p717_p2 = scmp.lt.s32.totalorder %s711_s10, %s711_s10 }
  0x13   :  { %626 = vmatmul.mubr.msk.f32.vlgmr.msra.gmra.mrb[0].mxu0 %vm61_vm1, %v45_v14 }
  0x14   :  { %655 = vmatprep.mubr.msk.f32.mxu0 %vm736_vm0, %v737_v6  ;;  %692 = vmatpush3.bf16.msra.mxu0 %v691_v41  ;;  %p718_p3 = por %p717_p2, %p716_p1 }
  0x16   :  { %p719_p4 = pnand %p718_p3, %p712_p0 }
  0xe6   :  { %v131_v22 = vpop.f32.mrb[0].mxu0 }
  0xe7   :  { %v132_v23 = vadd.f32 %v570_v21, %v131_v22  ;;  %v627_v24 = vpop.f32.mrb[1].mxu0 }
  0xe9   :  { %703 = vtanh.f32 %v132_v23 }
  0xf3   :  { %v704_v25 = vpop.eup %703 }
  0xf4   :  { %637 = vmatmul.mubr.msk.f32.vlgmr.msra.gmra.mrb[0].mxu1 %vm147_vm2, %v704_v25 }
  0xf5   :  { %643 = vmatprep.mubr.msk.f32.mxu1 %vm736_vm0, %v737_v6  ;;  %689 = vmatpush3.bf16.msra.mxu1 %v688_v28 }
  0xf6   :  { %646 = vmatprep.subr.mxu1 %v737_v6 }
 0x1c7   :  { %v217_v30 = vpop.f32.mrb[0].mxu1 }
 0x1c8   :  { %v218_v31 = vadd.f32 %v572_v29, %v217_v30  ;;  %v638_v32 = vpop.f32.mrb[1].mxu1 }
 0x1ca   :  { %705 = vtanh.f32 %v218_v31 }
 0x1d4   :  { %v706_v34 = vpop.eup %705 }
 0x1d5   :  { %644 = vmatmul.mubr.msk.f32.vlgmr.msra.gmra.mrb[2].mxu1 %vm231_vm3, %v706_v34 }
 0x1d6   :  { %647 = vmatpush3.msra.mxu1 %v305_v33  ;;  %648 = vmatprep.mubr.msk.f32.mxu1 %vm736_vm0, %v737_v6 }
 0x1d7   :  { %693 = vmatprep.subr.bf16.mxu1 %v735_v3 }
 0x2a8   :  { %v301_v36 = vpop.f32.mrb[2].mxu1 }
 0x2a9   :  { %v302_v37 = vadd.f32 %v574_v35, %v301_v36  ;;  %v645_v38 = vpop.f32.mrb[3].mxu1 }
 0x2ab   :  { %649 = vmatmul.mubr.msk.f32.vlgmr.msra.gmra.mrb[4].mxu1 %vm313_vm4, %v302_v37 }
 0x2ac   :  { %666 = vmatprep.mubr.msk.f32.mxu1 %vm736_vm0, %v737_v6  ;;  %695 = vmatpush3.bf16.msra.mxu1 %v694_v50 }
 0x2ad   :  { %696 = vmatprep.subr.bf16.mxu1 %v735_v3 }
 0x2b0   :  { %698 = vmatpush3.bf16.msra.mxu1 %v697_v52 }
 0x37e   :  { %v383_v43 = vpop.f32.mrb[4].mxu1 }
 0x37f   :  { %v384_v44 = vadd.f32 %v576_v42, %v383_v43  ;;  %v650_v45 = vpop.f32.mrb[5].mxu1 }
 0x381   :  { %707 = vtanh.f32 %v384_v44 }
 0x38b   :  { %v708_v46 = vpop.eup %707 }
 0x38c   :  { %656 = vmatmul.mubr.msk.f32.vlgmr.msra.gmra.mrb[2].mxu0 %vm231_vm3, %v708_v46 }
 0x45f   :  { %v466_v54 = vpop.f32.mrb[2].mxu0 }
 0x460   :  { %v467_v55 = vadd.f32 %v578_v53, %v466_v54  ;;  %v657_v56 = vpop.f32.mrb[3].mxu0 }
 0x462   :  { %709 = vtanh.f32 %v467_v55 }
 0x46c   :  { %v710_v57 = vpop.eup %709 }
 0x46d   :  { %667 = vmatmul.mubr.msk.f32.vlgmr.msra.gmra.mrb[6].mxu1 %vm147_vm2, %v710_v57 }
 0x540   :  { %v551_v59 = vpop.f32.mrb[6].mxu1 }
 0x541   :  { %v552_v60 = vadd.f32 %v580_v58, %v551_v59  ;;  %v668_v61 = vpop.f32.mrb[7].mxu1 }
 0x543   :  { %555 = vst.msk [vmem:[#allocation2] sm:$0xff] %vm61_vm1, %v552_v60 }
 0x544   :  { %722 = shalt.err (!%p719_p4)
}
 0x545   :  { %s723_s2 = scalar_lea.hbm %s947_s13, 128 }
 0x546   :  { %p724_p5 = scmp.ne.s32.totalorder %s947_s13, %s723_s2  ;;  %p727_p6 = scmp.lt.u32.totalorder %s723_s2, %s947_s13 }
 0x548   :  { %p729_p7 = pnand %p727_p6, %p724_p5 }
 0x54a   :  { %732 = shalt.err (!%p729_p7)
}
 0x54b   :  { %565 = dma.vmem_to_hbm [thread:$0]  %s563_s17, 128, %s947_s13, [#allocation3]  }
 0x54c   :  { %733 = dma.done.wait [#allocation3], 128  }
 0x54d   :  { %734 = vsyncadd [#allocation3], 4294967168 }
 0x54e   :  { %569 = vsyncpa [#allocation3], 1 }

</bundles_post_ra>
